<compile_context>
chip_gen: v7x
topology: tpu7x:2x2x1
jax: 0.10.0
libtpu: 0.0.40
codegen_flags: <defaults>
</compile_context>

<pallas_src>
import math
import functools

import jax
import jax.numpy as jnp
from jax.experimental import pallas as pl
from jax.experimental.pallas import tpu as pltpu


# ---------------------------------------------------------------------------
# In-kernel helpers
# ---------------------------------------------------------------------------
def _layer_norm(y, g, b, eps=1e-6):
    mu = jnp.mean(y, axis=-1, keepdims=True)
    var = jnp.mean(jnp.square(y - mu), axis=-1, keepdims=True)
    return (y - mu) * jax.lax.rsqrt(var + eps) * g + b


# ---------------------------------------------------------------------------
# Fused transformer Block kernel: MHA (no residual, matches torch Block) ->
# PositionwiseFeedForward -> +residual -> LayerNorm.   One grid step = one
# (effective) batch element, whole (L, D) tile in VMEM.
# ---------------------------------------------------------------------------
def block_kernel(x_ref, wqkv_ref, bqkv_ref, wo_ref, bo_ref,
                 w1_ref, b1_ref, w2_ref, b2_ref, g_ref, be_ref,
                 o_ref, *, num_heads):
    x = x_ref[0].astype(jnp.float32)                     # (L, D)
    L, D = x.shape
    H = num_heads
    Dh = D // H
    scale = 1.0 / math.sqrt(Dh)

    # --- packed, head-batched QKV projection: one batched MXU stream --------
    # wqkv_ref: (3H, D, Dh)  [Q heads | K heads | V heads], already (in, out).
    xb = jnp.broadcast_to(x, (3 * H, L, D))              # leading-dim bcast
    qkv = jnp.einsum('bld,bdk->blk', xb, wqkv_ref[...],
                     preferred_element_type=jnp.float32) + bqkv_ref[...]
    q = qkv[:H] * scale                                  # (H, L, Dh)  (leading-dim slices: free)
    k = qkv[H:2 * H]
    v = qkv[2 * H:]

    # --- head-batched attention ---------------------------------------------
    s = jnp.einsum('bqd,bkd->bqk', q, k,
                   preferred_element_type=jnp.float32)   # (H, L, L)
    s = s - jnp.max(s, axis=-1, keepdims=True)
    p = jnp.exp(s)
    p = p * pl.reciprocal(jnp.sum(p, axis=-1, keepdims=True), approx=True)
    o = jnp.einsum('bqk,bkd->bqd', p, v,
                   preferred_element_type=jnp.float32)   # (H, L, Dh)

    # --- output projection accumulated per head (no lane concatenate) -------
    # wo_ref: (H, Dh, D);  concat_h(o_h) @ Wo.T == sum_h o_h @ wo_ref[h]
    a = jnp.einsum('bld,bdk->blk', o, wo_ref[...],
                   preferred_element_type=jnp.float32)   # (H, L, D)
    attn = a[0]
    for h in range(1, H):
        attn = attn + a[h]
    attn = attn + bo_ref[...]                            # (L, D)

    # --- PositionwiseFeedForward + residual + LayerNorm(eps=1e-6) -----------
    h1 = jnp.dot(attn, w1_ref[...], preferred_element_type=jnp.float32) + b1_ref[...]
    h1 = jnp.maximum(h1, 0.0)
    y = jnp.dot(h1, w2_ref[...], preferred_element_type=jnp.float32) + b2_ref[...] + attn
    o_ref[0] = _layer_norm(y, g_ref[...], be_ref[...]).astype(o_ref.dtype)


# ---------------------------------------------------------------------------
# Spatial front-end kernel:  LN( x @ W_embed + (bias + Spatial_pos_embed) )
# (the Linear bias and the positional embedding are pre-summed on the host)
# ---------------------------------------------------------------------------
def embed_norm_kernel(x_ref, w_ref, bias_ref, g_ref, b_ref, o_ref):
    x = x_ref[0].astype(jnp.float32)                                    # (P, C)
    y = jnp.dot(x, w_ref[...], preferred_element_type=jnp.float32) + bias_ref[...]
    o_ref[0] = _layer_norm(y, g_ref[...], b_ref[...]).astype(o_ref.dtype)


# ---------------------------------------------------------------------------
# Temporal front-end kernel:  LN( x + Temporal_pos_embed )
# ---------------------------------------------------------------------------
def add_norm_kernel(x_ref, pos_ref, g_ref, b_ref, o_ref):
    y = x_ref[0].astype(jnp.float32) + pos_ref[...]
    o_ref[0] = _layer_norm(y, g_ref[...], b_ref[...]).astype(o_ref.dtype)


# ---------------------------------------------------------------------------
# Wrappers
# ---------------------------------------------------------------------------
def _const_spec(shape):
    zeros = (0,) * len(shape)
    return pl.BlockSpec(shape, lambda i, _z=zeros: _z)


def block_forward(x, kp, num_heads):
    B, L, D = x.shape
    H = num_heads
    Dh = D // H
    Hd = kp["w1"].shape[1]
    kernel = functools.partial(block_kernel, num_heads=H)
    return pl.pallas_call(
        kernel,
        out_shape=jax.ShapeDtypeStruct((B, L, D), x.dtype),
        grid=(B,),
        in_specs=[
            pl.BlockSpec((1, L, D), lambda b: (b, 0, 0)),
            _const_spec((3 * H, D, Dh)), _const_spec((3 * H, 1, Dh)),
            _const_spec((H, Dh, D)), _const_spec((1, D)),
            _const_spec((D, Hd)), _const_spec((1, Hd)),
            _const_spec((Hd, D)), _const_spec((1, D)),
            _const_spec((1, D)), _const_spec((1, D)),
        ],
        out_specs=pl.BlockSpec((1, L, D), lambda b: (b, 0, 0)),
        compiler_params=pltpu.CompilerParams(dimension_semantics=("parallel",)),
    )(x, kp["w_qkv"], kp["b_qkv"], kp["w_o"], kp["b_o"],
      kp["w1"], kp["b1"], kp["w2"], kp["b2"], kp["gamma"], kp["beta"])


def spatial_embed(x, kp):
    BF, P, C = x.shape
    Dr = kp["w_e"].shape[1]
    return pl.pallas_call(
        embed_norm_kernel,
        out_shape=jax.ShapeDtypeStruct((BF, P, Dr), jnp.float32),
        grid=(BF,),
        in_specs=[
            pl.BlockSpec((1, P, C), lambda i: (i, 0, 0)),
            _const_spec((C, Dr)), _const_spec((P, Dr)),
            _const_spec((1, Dr)), _const_spec((1, Dr)),
        ],
        out_specs=pl.BlockSpec((1, P, Dr), lambda i: (i, 0, 0)),
        compiler_params=pltpu.CompilerParams(dimension_semantics=("parallel",)),
    )(x, kp["w_e"], kp["bias"], kp["g"], kp["b"])


def temporal_pos_norm(x, kp):
    B, F, E = x.shape
    return pl.pallas_call(
        add_norm_kernel,
        out_shape=jax.ShapeDtypeStruct((B, F, E), jnp.float32),
        grid=(B,),
        in_specs=[
            pl.BlockSpec((1, F, E), lambda i: (i, 0, 0)),
            _const_spec((F, E)), _const_spec((1, E)), _const_spec((1, E)),
        ],
        out_specs=pl.BlockSpec((1, F, E), lambda i: (i, 0, 0)),
        compiler_params=pltpu.CompilerParams(dimension_semantics=("parallel",)),
    )(x, kp["pos"], kp["g"], kp["b"])


def encoder_forward(kparams, prv_seq, num_heads):
    """Matches Encoder.forward (eval mode, all dropout rates 0)."""
    b, f, p, c = prv_seq.shape
    Dr = kparams["embed"]["w_e"].shape[1]
    # permute(0,3,1,2) + rearrange 'b c f p -> (b f) p c'  ==  plain reshape
    x = prv_seq.reshape(b * f, p, c)
    x = spatial_embed(x, kparams["embed"])                 # Linear + pos + norm1
    for bp in kparams["spatial_blocks"]:
        x = block_forward(x, bp, num_heads)
    x = x.reshape(b, f, p * Dr)                            # '(b f) w c -> b f (w c)'
    x = temporal_pos_norm(x, kparams["temporal_in"])       # + Temporal_pos_embed, norm2
    for bp in kparams["temporal_blocks"]:
        x = block_forward(x, bp, num_heads)
    return x


# ---------------------------------------------------------------------------
# Parameter init (torch layout) and host-side re-arrangement to kernel layout
# ---------------------------------------------------------------------------
def init_torch_params(key, *, num_frame, num_joints, in_chans,
                      embed_dim_ratio, depth, mlp_ratio):
    Dr = embed_dim_ratio
    E = Dr * num_joints
    n_keys = 4 + 24 * depth
    keys = iter(jax.random.split(key, n_keys))
    nrm = lambda k, shape, s=0.05: (s * jax.random.normal(k, shape)).astype(jnp.float32)

    def block_params(D):
        Hd = int(D * mlp_ratio)
        return {
            "wq": nrm(next(keys), (D, D)), "bq": nrm(next(keys), (D,)),
            "wk": nrm(next(keys), (D, D)), "bk": nrm(next(keys), (D,)),
            "wv": nrm(next(keys), (D, D)), "bv": nrm(next(keys), (D,)),
            "wo": nrm(next(keys), (D, D)), "bo": nrm(next(keys), (D,)),
            "w1": nrm(next(keys), (Hd, D)), "b1": nrm(next(keys), (Hd,)),
            "w2": nrm(next(keys), (D, Hd)), "b2": nrm(next(keys), (D,)),
            "ln_g": jnp.ones((D,), jnp.float32), "ln_b": jnp.zeros((D,), jnp.float32),
        }

    return {
        "embed_w": nrm(next(keys), (Dr, in_chans), 0.3),
        "embed_b": nrm(next(keys), (Dr,), 0.1),
        "spatial_pos": nrm(next(keys), (num_joints, Dr), 0.1),
        "norm1_g": jnp.ones((Dr,), jnp.float32), "norm1_b": jnp.zeros((Dr,), jnp.float32),
        "temporal_pos": nrm(next(keys), (num_frame, E), 0.1),
        "norm2_g": jnp.ones((E,), jnp.float32), "norm2_b": jnp.zeros((E,), jnp.float32),
        "spatial_blocks": [block_params(Dr) for _ in range(depth)],
        "temporal_blocks": [block_params(E) for _ in range(depth)],
    }


def _prep_block(p, H):
    """Torch-layout block params -> kernel layout (transposed / per-head)."""
    D = p["wq"].shape[0]
    Dh = D // H

    def heads_t(w):  # (D, D) (out,in) -> (H, D, Dh) with [h] = W[h*Dh:(h+1)*Dh, :].T
        return jnp.transpose(w.reshape(H, Dh, D), (0, 2, 1))

    w_qkv = jnp.concatenate([heads_t(p["wq"]), heads_t(p["wk"]), heads_t(p["wv"])], axis=0)
    b_qkv = jnp.concatenate([p["bq"].reshape(H, 1, Dh),
                             p["bk"].reshape(H, 1, Dh),
                             p["bv"].reshape(H, 1, Dh)], axis=0)
    return {
        "w_qkv": w_qkv, "b_qkv": b_qkv,
        "w_o": p["wo"].T.reshape(H, Dh, D), "b_o": p["bo"].reshape(1, D),
        "w1": p["w1"].T, "b1": p["b1"].reshape(1, -1),
        "w2": p["w2"].T, "b2": p["b2"].reshape(1, -1),
        "gamma": p["ln_g"].reshape(1, D), "beta": p["ln_b"].reshape(1, D),
    }


def prepare_kernel_params(tp, H):
    Dr = tp["embed_w"].shape[0]
    E = tp["norm2_g"].shape[0]
    return {
        "embed": {
            "w_e": tp["embed_w"].T,                              # (C, Dr)
            "bias": tp["spatial_pos"] + tp["embed_b"][None, :],  # (P, Dr)
            "g": tp["norm1_g"].reshape(1, Dr), "b": tp["norm1_b"].reshape(1, Dr),
        },
        "temporal_in": {
            "pos": tp["temporal_pos"],
            "g": tp["norm2_g"].reshape(1, E), "b": tp["norm2_b"].reshape(1, E),
        },
        "spatial_blocks": [_prep_block(p, H) for p in tp["spatial_blocks"]],
        "temporal_blocks": [_prep_block(p, H) for p in tp["temporal_blocks"]],
    }


# ---------------------------------------------------------------------------
# Pure-JAX reference (mirrors the torch module exactly) for a sanity check
# ---------------------------------------------------------------------------
def _ref_ln(y, g, b, eps=1e-6):
    mu = y.mean(-1, keepdims=True)
    var = ((y - mu) ** 2).mean(-1, keepdims=True)
    return (y - mu) / jnp.sqrt(var + eps) * g + b


def _ref_block(x, p, H):
    B, L, D = x.shape
    Dh = D // H
    q = x @ p["wq"].T + p["bq"]
    k = x @ p["wk"].T + p["bk"]
    v = x @ p["wv"].T + p["bv"]
    split = lambda t: t.reshape(B, L, H, Dh).transpose(0, 2, 1, 3)
    qh, kh, vh = split(q), split(k), split(v)
    s = jnp.einsum("bhqd,bhkd->bhqk", qh, kh) / math.sqrt(Dh)
    w = jax.nn.softmax(s, axis=-1)
    o = jnp.einsum("bhqk,bhkd->bhqd", w, vh).transpose(0, 2, 1, 3).reshape(B, L, D)
    attn = o @ p["wo"].T + p["bo"]
    h1 = jax.nn.relu(attn @ p["w1"].T + p["b1"])
    y = h1 @ p["w2"].T + p["b2"] + attn
    return _ref_ln(y, p["ln_g"], p["ln_b"])


def _ref_encoder(tp, prv_seq, H):
    b, f, p, c = prv_seq.shape
    Dr = tp["embed_w"].shape[0]
    x = prv_seq.reshape(b * f, p, c)
    x = x @ tp["embed_w"].T + tp["embed_b"] + tp["spatial_pos"]
    x = _ref_ln(x, tp["norm1_g"], tp["norm1_b"])
    for bp in tp["spatial_blocks"]:
        x = _ref_block(x, bp, H)
    x = x.reshape(b, f, p * Dr)
    x = x + tp["temporal_pos"][:f]
    x = _ref_ln(x, tp["norm2_g"], tp["norm2_b"])
    for bp in tp["temporal_blocks"]:
        x = _ref_block(x, bp, H)
    return x


# ---------------------------------------------------------------------------
if __name__ == "__main__":
    # Small shapes consistent with Encoder(num_frame, num_joints, in_chans=3,
    # embed_dim_ratio=32, num_heads=8, mlp_ratio=2.0, depth=2).
    B, NUM_FRAME, NUM_JOINTS, IN_CHANS = 2, 9, 8, 3
    EMBED_RATIO, HEADS, DEPTH, MLP_RATIO = 32, 8, 2, 2.0
    EMBED_DIM = EMBED_RATIO * NUM_JOINTS      # 256

    key = jax.random.PRNGKey(0)
    k_x, k_p = jax.random.split(key)
    prv_seq = jax.random.normal(k_x, (B, NUM_FRAME, NUM_JOINTS, IN_CHANS), jnp.float32)

    tparams = init_torch_params(
        k_p, num_frame=NUM_FRAME, num_joints=NUM_JOINTS, in_chans=IN_CHANS,
        embed_dim_ratio=EMBED_RATIO, depth=DEPTH, mlp_ratio=MLP_RATIO)
    kparams = prepare_kernel_params(tparams, HEADS)

    out = encoder_forward(kparams, prv_seq, HEADS)
    out = jax.block_until_ready(out)

    ref = _ref_encoder(tparams, prv_seq, HEADS)
    assert out.shape == (B, NUM_FRAME, EMBED_DIM), out.shape
    assert jnp.allclose(out, ref, rtol=5e-3, atol=5e-3), "mismatch vs JAX reference"

    print("KERNEL_OK")
</pallas_src>

<mosaic_0001>
module attributes {stable_mosaic.version = 11 : i64} {
  func.func @embed_norm_kernel(%arg0: i32, %arg1: memref<1x8x3xf32, #tpu.memory_space<vmem>>, %arg2: memref<3x32xf32, #tpu.memory_space<vmem>>, %arg3: memref<8x32xf32, #tpu.memory_space<vmem>>, %arg4: memref<1x32xf32, #tpu.memory_space<vmem>>, %arg5: memref<1x32xf32, #tpu.memory_space<vmem>>, %arg6: memref<1x8x32xf32, #tpu.memory_space<vmem>>) attributes {dimension_semantics = [#tpu.dimension_semantics<parallel>], iteration_bounds = array<i64: 18>, scalar_prefetch = 0 : i64, scratch_operands = 0 : i64, tpu.core_type = #tpu.core_type<tc>, window_params = [{transform_indices = @transform_0, window_bounds = array<i64: 1, 8, 3>}, {pipeline_mode = #tpu.pipeline_mode<synchronous>, transform_indices = @transform_1, window_bounds = array<i64: 3, 32>}, {pipeline_mode = #tpu.pipeline_mode<synchronous>, transform_indices = @transform_2, window_bounds = array<i64: 8, 32>}, {pipeline_mode = #tpu.pipeline_mode<synchronous>, transform_indices = @transform_3, window_bounds = array<i64: 1, 32>}, {pipeline_mode = #tpu.pipeline_mode<synchronous>, transform_indices = @transform_4, window_bounds = array<i64: 1, 32>}, {transform_indices = @transform_5, window_bounds = array<i64: 1, 8, 32>}]} {
    %c0 = arith.constant 0 : index
    %c0_0 = arith.constant 0 : index
    %c0_1 = arith.constant 0 : index
    %0 = vector.load %arg1[%c0, %c0_0, %c0_1] : memref<1x8x3xf32, #tpu.memory_space<vmem>>, vector<1x8x3xf32>
    %1 = vector.shape_cast %0 : vector<1x8x3xf32> to vector<8x3xf32>
    %c0_2 = arith.constant 0 : index
    %c0_3 = arith.constant 0 : index
    %2 = vector.load %arg2[%c0_2, %c0_3] : memref<3x32xf32, #tpu.memory_space<vmem>>, vector<3x32xf32>
    %cst = arith.constant dense<0.000000e+00> : vector<8x32xf32>
    %3 = tpu.matmul %1, %2, %cst {dimension_numbers = #tpu.dot_dimension_numbers<[1], [0], [0], [1], [0, 0, 1, 1], [], []>} : vector<8x3xf32>, vector<3x32xf32>, vector<8x32xf32> -> vector<8x32xf32>
    %c0_4 = arith.constant 0 : index
    %c0_5 = arith.constant 0 : index
    %4 = vector.load %arg3[%c0_4, %c0_5] : memref<8x32xf32, #tpu.memory_space<vmem>>, vector<8x32xf32>
    %5 = arith.addf %3, %4 : vector<8x32xf32>
    %c0_6 = arith.constant 0 : index
    %c0_7 = arith.constant 0 : index
    %6 = vector.load %arg4[%c0_6, %c0_7] : memref<1x32xf32, #tpu.memory_space<vmem>>, vector<1x32xf32>
    %c0_8 = arith.constant 0 : index
    %c0_9 = arith.constant 0 : index
    %7 = vector.load %arg5[%c0_8, %c0_9] : memref<1x32xf32, #tpu.memory_space<vmem>>, vector<1x32xf32>
    %cst_10 = arith.constant dense<0.000000e+00> : vector<8xf32>
    %8 = vector.multi_reduction <add>, %5, %cst_10 [1] : vector<8x32xf32> to vector<8xf32>
    %9 = vector.shape_cast %8 : vector<8xf32> to vector<8x1xf32>
    %cst_11 = arith.constant 3.200000e+01 : f32
    %10 = vector.broadcast %cst_11 : f32 to vector<8x1xf32>
    %11 = arith.divf %9, %10 : vector<8x1xf32>
    %12 = vector.broadcast %11 : vector<8x1xf32> to vector<8x32xf32>
    %13 = arith.subf %5, %12 : vector<8x32xf32>
    %14 = arith.mulf %13, %13 : vector<8x32xf32>
    %cst_12 = arith.constant dense<0.000000e+00> : vector<8xf32>
    %15 = vector.multi_reduction <add>, %14, %cst_12 [1] : vector<8x32xf32> to vector<8xf32>
    %16 = vector.shape_cast %15 : vector<8xf32> to vector<8x1xf32>
    %cst_13 = arith.constant 3.200000e+01 : f32
    %17 = vector.broadcast %cst_13 : f32 to vector<8x1xf32>
    %18 = arith.divf %16, %17 : vector<8x1xf32>
    %19 = vector.broadcast %11 : vector<8x1xf32> to vector<8x32xf32>
    %20 = arith.subf %5, %19 : vector<8x32xf32>
    %cst_14 = arith.constant 9.99999997E-7 : f32
    %21 = vector.broadcast %cst_14 : f32 to vector<8x1xf32>
    %22 = arith.addf %18, %21 : vector<8x1xf32>
    %23 = math.rsqrt %22 : vector<8x1xf32>
    %24 = vector.broadcast %23 : vector<8x1xf32> to vector<8x32xf32>
    %25 = arith.mulf %20, %24 : vector<8x32xf32>
    %26 = vector.broadcast %6 : vector<1x32xf32> to vector<8x32xf32>
    %27 = arith.mulf %25, %26 : vector<8x32xf32>
    %28 = vector.broadcast %7 : vector<1x32xf32> to vector<8x32xf32>
    %29 = arith.addf %27, %28 : vector<8x32xf32>
    %c0_15 = arith.constant 0 : index
    %c0_16 = arith.constant 0 : index
    %c0_17 = arith.constant 0 : index
    %30 = vector.load %arg6[%c0_15, %c0_16, %c0_17] : memref<1x8x32xf32, #tpu.memory_space<vmem>>, vector<1x8x32xf32>
    %31 = vector.shape_cast %30 : vector<1x8x32xf32> to vector<8x32xf32>
    %32 = vector.shape_cast %29 : vector<8x32xf32> to vector<1x8x32xf32>
    tpu.vector_store %arg6[%c0_15, %c0_16, %c0_17], %32 {strides = array<i32>} : memref<1x8x32xf32, #tpu.memory_space<vmem>>, vector<1x8x32xf32>,
    return
  }
  func.func @transform_0(%arg0: i32) -> (i32, i32, i32) {
    %c0_i32 = arith.constant 0 : i32
    %c0_i32_0 = arith.constant 0 : i32
    %c0_i32_1 = arith.constant 0 : i32
    return %arg0, %c0_i32, %c0_i32_0 : i32, i32, i32
  }
  func.func @transform_1(%arg0: i32) -> (i32, i32) {
    %c0_i32 = arith.constant 0 : i32
    %c0_i32_0 = arith.constant 0 : i32
    %c0_i32_1 = arith.constant 0 : i32
    return %c0_i32, %c0_i32_0 : i32, i32
  }
  func.func @transform_2(%arg0: i32) -> (i32, i32) {
    %c0_i32 = arith.constant 0 : i32
    %c0_i32_0 = arith.constant 0 : i32
    %c0_i32_1 = arith.constant 0 : i32
    return %c0_i32, %c0_i32_0 : i32, i32
  }
  func.func @transform_3(%arg0: i32) -> (i32, i32) {
    %c0_i32 = arith.constant 0 : i32
    %c0_i32_0 = arith.constant 0 : i32
    %c0_i32_1 = arith.constant 0 : i32
    return %c0_i32, %c0_i32_0 : i32, i32
  }
  func.func @transform_4(%arg0: i32) -> (i32, i32) {
    %c0_i32 = arith.constant 0 : i32
    %c0_i32_0 = arith.constant 0 : i32
    %c0_i32_1 = arith.constant 0 : i32
    return %c0_i32, %c0_i32_0 : i32, i32
  }
  func.func @transform_5(%arg0: i32) -> (i32, i32, i32) {
    %c0_i32 = arith.constant 0 : i32
    %c0_i32_0 = arith.constant 0 : i32
    %c0_i32_1 = arith.constant 0 : i32
    return %arg0, %c0_i32, %c0_i32_0 : i32, i32, i32
  }
}

</mosaic_0001>

<bundles_post_ra>
// kernel: tpu_custom_call.1
= control target key start
LH: loop header
LB: loop body
LE: loop exit
PB: predicated region body
PF: predicated region fallthrough
CT: control target
= control target key end

     0   :  { %10 = vsyncpa [#allocation3], 0  ;;  %s682_s0 = inlined_call_operand.vmem [shape: f32[18,8,3], index: 0, kind: input, shape index: {}]   ;;  %s683_s1 = inlined_call_operand.vmem [shape: f32[3,32], index: 1, kind: input, shape index: {}]   ;;  %s684_s2 = inlined_call_operand.vmem [shape: f32[8,32], index: 2, kind: input, shape index: {}]   ;;  %s685_s3 = inlined_call_operand.vmem [shape: f32[1,32], index: 3, kind: input, shape index: {}]   ;;  %s686_s4 = inlined_call_operand.vmem [shape: f32[1,32], index: 4, kind: input, shape index: {}]   ;;  %s687_s5 = inlined_call_operand.hbm [shape: f32[18,8,32], index: 5, kind: output, shape index: {}]  }
   0x1   :  { %12 = vsyncpa [#allocation3 + $0x1], 0  ;;  %s567_s18 = smov 0   ;;  %s569_s19 = smov 0  }
   0x2   :  { %s571_s20 = smov 0   ;;  %s573_s21 = smov 0  }
   0x3 LB: > { %s588_s22 = sadd.s32 4294967295, %s532_s21   ;;  %s406_s23 = sadd.s32 4294967294, %s532_s21   ;;  %s532_s21 = sphi %s573_s21, %s693_s21   ;;  %s528_s20 = sphi %s571_s20, %s692_s20   ;;  %s524_s19 = sphi %s569_s19, %s691_s19   ;;  %s520_s18 = sphi %s567_s18, %s690_s18  }
   0x4   : > { %s592_s24 = sadd.s32 1, %s532_s21   ;;  %s135_s25 = sadd.s32 1, %s528_s20 }
   0x5   : > { %s132_s26 = ssub.s32 %s532_s21, %s592_s24  ;;  %p145_p0 = scmp.ne.s32.totalorder %s528_s20, %s524_s19 }
   0x6   : > { %p133_p1 = scmp.eq.s32.totalorder %s132_s26, 0  ;;  %p146_p2 = scmp.eq.s32.totalorder %s588_s22, 17 }
   0x7   : > { %p151_p3 = scmp.ne.s32.totalorder %s524_s19, %s520_s18  ;;  %p152_p4 = scmp.eq.s32.totalorder %s406_s23, 17 }
   0x8   : > { %s603_s27 = scalar_select %p133_p1, %s528_s20, %s135_s25  }
   0x9   : > { %p605_p5 = por %p146_p2, %p145_p0  ;;  %p609_p6 = por %p152_p4, %p151_p3 }
   0xa   : > { %p409_p7 = scmp.ge.s32.totalorder %s532_s21, 1  ;;  %p189_p8 = scmp.lt.s32.totalorder %s532_s21, 19 }
   0xc   : > { %p190_p9 = pnand %p409_p7, %p189_p8 }
   0xd   : > { %v221_v0 = vld [vmem:[%s683_s1] sm:$0x7] (!%p190_p9)  ;;  %vm227_vm0 = vcmask (!%p190_p9), 1042432   ;;  %p216_p10 = scmp.lt.s32.totalorder (!%p190_p9), %s588_s22, 17  ;;  %v534_v1 = vmov (!%p190_p9), 0.0   ;;  %vm535_vm1 = vmmov (!%p190_p9), 0  }
   0xe   : > { %193 = sbr.rel (%p190_p9) target bundleno = 567 (0x237), region = 40  ;;  %422 = vmatprep.subr.mxu0 (!%p190_p9), %v534_v1  ;;  %424 = vmatprep.mubr.msk.f32.mxu0 (!%p190_p9), %vm535_vm1, %v534_v1  ;;  %vm223_vm2 = vcmask (!%p190_p9), 23552   ;;  %v222_v3 = vld [vmem:[%s684_s2] sm:$0xff] (!%p190_p9)  ;;  %vm303_vm3 = vcmask (!%p190_p9), 261120   ;;  %s213_s14 = sand.u32 (!%p190_p9), 1, %s524_s19  }
   0xf   : > { %423 = vmatpush3.msk.msra.mxu0 (!%p190_p9), %vm227_vm0, %v221_v0  ;;  %s410_s15 = sshll.u32 (!%p190_p9), %s213_s14, 3  ;;  %v414_v17 = vld [vmem:[%s685_s3] ss:$0 sm:$0xff] (!%p190_p9)  ;;  %s417_s26 = sshll.u32 (!%p190_p9), %s588_s22, 7 }
  0x10   : > { %v415_v19 = vld [vmem:[%s686_s4] ss:$0 sm:$0xff] (!%p190_p9)  ;;  %s215_s30 = scalar_lea.vmem (!%p190_p9), [#allocation2], %s410_s15  ;;  %s639_s9 = scalar_lea.hbm (!%p190_p9), %s687_s5, %s417_s26 }
  0x11   : > { %s347_s6 = sshll.u32 (!%p190_p9), %s215_s30, 4  ;;  %s334_s10 = scalar_lea.sflag (!%p190_p9), [#allocation3], %s213_s14  ;;  %s641_s6 = int_to_ptr.vmem [resolvable:$true] %s347_s6 }
  0x15   : > { %s217_s7 = scalar_select %p216_p10, %s588_s22, 17 }
  0x16   : > { %s536_s22 = smov [#allocation2]  }
  0x17   : > { %s411_s8 = sshll.u32 %s217_s7, 3  ;;  %s474_s12 = sshll.u32 %s536_s22, 4  ;;  %s475_s12 = int_to_ptr.vmem [resolvable:$false] %s474_s12 }
  0x18   : > { %s219_s11 = scalar_lea.vmem %s682_s0, %s411_s8  ;;  %s476_s13 = scalar_lea.vmem %s475_s12, 256 }
  0x19   : > { %v220_v2 = vld [vmem:[%s219_s11] sm:$0xff]  ;;  %s470_s11 = scalar_lea.vmem %s641_s6, 128  ;;  %p477_p0 = scmp.lt.s32.totalorder %s641_s6, %s475_s12 }
  0x1a   : > { %425 = vmatmul.mubr.msk.f32.vlgmr.msra.gmra.mrb[0].mxu0 %vm223_vm2, %v220_v2  ;;  %p471_p11 = scmp.ne.s32.totalorder %s641_s6, %s470_s11  ;;  %p478_p1 = scmp.lt.s32.totalorder %s476_s13, %s470_s11 }
  0x1c   : > { %p472_p12 = pnand %p471_p11, %p605_p5  ;;  %p479_p2 = por %p478_p1, %p477_p0 }
  0x1e   : > { %p473_p13 = pneg %p472_p12 }
  0x20   : > { %p480_p3 = pnand %p479_p2, %p473_p13 }
  0xed   : > { %v297_v4 = vpop.f32.mrb[0].mxu0 }
  0xee   : > { %v298_v5 = vadd.f32 %v297_v4, %v222_v3  ;;  %v426_v6 = vpop.f32.mrb[1].mxu0 }
  0xf0   : > { %v304_v7 = vsel %vm303_vm3, %v298_v5, 0.0 }
  0xf1   : > { %305 = vadd.xlane.f32.xlu0 %v304_v7 }
 0x17e   : > { %v306_v8 = vpop.xlane.xlu0 %305 }
 0x17f   : > { %v308_v9 = vmul.f32 0.03125, %v306_v8 }
 0x181   : > { %v309_v10 = vsub.f32 %v298_v5, %v308_v9 }
 0x183   : > { %v310_v11 = vmul.f32 %v309_v10, %v309_v10 }
 0x185   : > { %v311_v12 = vsel %vm303_vm3, %v310_v11, 0.0 }
 0x186   : > { %312 = vadd.xlane.f32.xlu0 %v311_v12 }
 0x213   : > { %v313_v13 = vpop.xlane.xlu0 %312 }
 0x214   : > { %v314_v14 = vmul.f32 0.03125, %v313_v13 }
 0x216   : > { %v315_v15 = vadd.f32 1e-06, %v314_v14 }
 0x218   : > { %468 = vrsqrt.f32 %v315_v15 }
 0x222   : > { %v469_v16 = vpop.eup %468 }
 0x223   : > { %v317_v18 = vmul.f32 %v469_v16, %v309_v10 }
 0x225   : > { %v324_v20 = vmul.f32 %v414_v17, %v317_v18 }
 0x227   : > { %v331_v21 = vadd.f32 %v415_v19, %v324_v20 }
 0x229   : > { %332 = vst.msk [vmem:[%s215_s30] sm:$0xff] %vm303_vm3, %v331_v21 }
 0x22a   : > { %483 = shalt.err (!%p480_p3)
}
 0x22b   : > { %s484_s14 = scalar_lea.hbm %s639_s9, 128  ;;  %s488_s17 = scalar_lea.hbm %s687_s5, 2304 }
 0x22c   : > { %p485_p4 = scmp.ne.s32.totalorder %s639_s9, %s484_s14  ;;  %p489_p9 = scmp.lt.u32.totalorder %s639_s9, %s687_s5 }
 0x22d   : > { %p490_p10 = scmp.lt.u32.totalorder %s488_s17, %s484_s14  ;;  %p492_p12 = scmp.lt.u32.totalorder %s484_s14, %s639_s9 }
 0x22e   : > { %p486_p7 = pnand %p485_p4, %p605_p5 }
 0x22f   : > { %p491_p11 = por %p490_p10, %p489_p9 }
 0x230   : > { %p487_p8 = pneg %p486_p7 }
 0x231   : > { %p493_p13 = por %p492_p12, %p491_p11 }
 0x233   : > { %p494_p0 = pnand %p493_p13, %p487_p8 }
 0x235   : > { %497 = shalt.err (!%p494_p0)
}
 0x236   : > { %427 = dma.vmem_to_hbm [thread:$0]  (%p605_p5), %s641_s6, 128, %s639_s9, %s334_s10  }
 0x237 PF: > { %p433_p1 = scmp.ge.s32.totalorder %s532_s21, 2  ;;  %s359_s26 = sand.u32 1, %s520_s18  }
 0x238   : > { %s360_s30 = scalar_lea.sflag [#allocation3], %s359_s26 }
 0x239   : > { %p430_p2 = pnand %p433_p1, %p609_p6 }
 0x23b   : > { %515 = dma.done.wait (!%p430_p2), %s360_s30, 128  }
 0x23c   : > { %517 = vsyncadd (!%p430_p2), %s360_s30, 4294967168  ;;  %p15_p3 = scmp.ge.s32.totalorder %s592_s24, 20   ;;  %s690_s18 = smov %s524_s19 }
 0x23d   : > { %s691_s19 = smov %s528_s20  ;;  %s692_s20 = smov %s603_s27 }
 0x23e   : > { %s693_s21 = smov %s592_s24  ;;  %17 = sbr.rel (!%p15_p3) target bundleno = 3 (0x3), region = 75 }
 0x245   :  { %365 = vsyncpa [#allocation3], 1 }
 0x246   :  { %367 = vsyncpa [#allocation3 + $0x1], 1 }

</bundles_post_ra>
